<compile_context>
chip_gen: v7x
topology: tpu7x:2x2x1
jax: 0.10.0
libtpu: 0.0.40
codegen_flags: <defaults>
</compile_context>

<pallas_src>
import functools

import jax
import jax.numpy as jnp
from jax.experimental import pallas as pl
from jax.experimental.pallas import tpu as pltpu


def _round_up(n, m):
    return (n + m - 1) // m * m


# ----------------------------- Pallas kernel ---------------------------------

def daud_kernel(x_ref, i_ref,
                ew1, eb1, ew2, eb2, ew3, eb3,
                dw1, db1, dw2, db2, dw3, db3,
                dom_ref, xhat_ref, z_ref):
    # x_ref:   [TB, Pi]  padded input rows (f32)
    # i_ref:   [TB, 1]   per-row domain label (int32)
    # e/d w*:  bf16 padded weights, e/d b*: [1, Pd] f32 padded biases
    # dom_ref: [2, Pl]   f32 (dom1, dom2) reparameterized shifts
    f32 = jnp.float32
    bf16 = jnp.bfloat16

    x = x_ref[...]
    lab = i_ref[...]                                     # [TB, 1] int32

    def dense(h, w_ref, b_ref, relu):
        y = jnp.dot(h.astype(bf16), w_ref[...],
                    preferred_element_type=f32) + b_ref[...]
        return jnp.maximum(y, 0.0) if relu else y

    # ----- Encoder: Linear -> ReLU -> Linear -> ReLU -> Linear ----------------
    h = dense(x, ew1, eb1, True)
    h = dense(h, ew2, eb2, True)
    z = dense(h, ew3, eb3, False)
    z_ref[...] = z

    # ----- per-row latent shift, selected BEFORE decoding ---------------------
    # torch semantics: label==1 -> z+dom1, label==0 -> z+dom2, else -> z (+0)
    shift = jnp.where(lab == 1, dom_ref[0:1, :],
                      jnp.where(lab == 0, dom_ref[1:2, :], 0.0))
    zz = z + shift

    # ----- Decoder: single pass ------------------------------------------------
    d = dense(zz, dw1, db1, True)
    d = dense(d, dw2, db2, True)
    xhat_ref[...] = dense(d, dw3, db3, False)


# ----------------------------- one-time param prep ----------------------------

def prepare_padded_params(params):
    """Pad every weight/bias to lane-dense (multiple-of-128) widths and cast the
    weights to bf16.  Called ONCE (per weight update), outside the hot path."""
    input_dim = params["ew1"].shape[0]
    hidden_dim = params["ew1"].shape[1]
    latent_dim = params["ew3"].shape[1]
    output_dim = params["dw3"].shape[1]
    Pi, Ph, Pl, Po = (_round_up(d, 128)
                      for d in (input_dim, hidden_dim, latent_dim, output_dim))

    def pad_w(a, r, c):             # zero-pad to [r, c], bf16 (exact zeros)
        a = jnp.pad(a, ((0, r - a.shape[0]), (0, c - a.shape[1])))
        return a.astype(jnp.bfloat16)

    def pad_b(v, c):                # [d] / [1, d] -> [1, c], f32
        v = v.reshape(1, -1).astype(jnp.float32)
        return jnp.pad(v, ((0, 0), (0, c - v.shape[1])))

    return dict(
        ew1=pad_w(params["ew1"], Pi, Ph), eb1=pad_b(params["eb1"], Ph),
        ew2=pad_w(params["ew2"], Ph, Ph), eb2=pad_b(params["eb2"], Ph),
        ew3=pad_w(params["ew3"], Ph, Pl), eb3=pad_b(params["eb3"], Pl),
        dw1=pad_w(params["dw1"], Pl, Ph), db1=pad_b(params["db1"], Ph),
        dw2=pad_w(params["dw2"], Ph, Ph), db2=pad_b(params["db2"], Ph),
        dw3=pad_w(params["dw3"], Ph, Po), db3=pad_b(params["db3"], Po),
        mu1=params["mu1"], logvar1=params["logvar1"],
        mu2=params["mu2"], logvar2=params["logvar2"],
    )


# ----------------------------- forward wrapper --------------------------------

@functools.partial(jax.jit, static_argnames=("output_dim",))
def daud_forward(x, i, padded, eps1, eps2, *, output_dim):
    """Returns (x_hat, mu1, mu2, logvar1, logvar2, z) like the PyTorch module."""
    mu1, logvar1 = padded["mu1"], padded["logvar1"]
    mu2, logvar2 = padded["mu2"], padded["logvar2"]

    # reparameterization (plain-JAX glue; noise drawn outside the kernel)
    dom1 = mu1 + jnp.exp(0.5 * logvar1) * eps1
    dom2 = mu2 + jnp.exp(0.5 * logvar2) * eps2

    B, input_dim = x.shape
    latent_dim = eps1.shape[0]
    Pi, Ph = padded["ew1"].shape
    Pl = padded["ew3"].shape[1]
    Po = padded["dw3"].shape[1]

    # tiny per-call dom slab [2, Pl]
    dom = jnp.stack([dom1, dom2], axis=0).astype(jnp.float32)
    dom = jnp.pad(dom, ((0, 0), (0, Pl - latent_dim)))

    # Batch tiling: aim for >=2 grid steps once B >= 16 (v7x megacore via
    # "parallel"), cap at 512 rows so per-step overhead is amortized on v5e/v6e.
    TB = min(512, max(8, _round_up((B + 1) // 2, 8)))
    Bp = _round_up(B, TB)

    x_pad = jnp.pad(x.astype(jnp.float32), ((0, Bp - B), (0, Pi - input_dim)))
    i_pad = jnp.pad(i.astype(jnp.int32).reshape(-1, 1), ((0, Bp - B), (0, 0)),
                    constant_values=-1)

    param_names = ("ew1", "eb1", "ew2", "eb2", "ew3", "eb3",
                   "dw1", "db1", "dw2", "db2", "dw3", "db3")
    param_arrays = [padded[n] for n in param_names] + [dom]

    # VMEM budget: double-buffered IO tiles + resident params + temp headroom,
    # clamped to leave headroom under v7x's 64 MiB physical VMEM.
    io_bytes = TB * (Pi + 1 + Po + Pl) * 4
    par_bytes = sum(a.size * a.dtype.itemsize for a in param_arrays)
    act_bytes = 4 * TB * max(Pi, Ph, Pl, Po) * 4
    needed = 2 * io_bytes + 2 * par_bytes + act_bytes + (2 << 20)
    vmem_limit = int(min(max(needed, 32 << 20), 56 << 20))
    # TODO(synk): if the resident weights exceed ~48 MiB (huge hidden dims on v7x),
    # stream decoder layers (per-layer grid axis / emit_pipeline) instead.

    # resident params: constant index_map -> fetched once, stays in VMEM.
    resident_specs = [pl.BlockSpec(a.shape, lambda b: (0, 0)) for a in param_arrays]

    x_hat_pad, z_pad = pl.pallas_call(
        daud_kernel,
        out_shape=(
            jax.ShapeDtypeStruct((Bp, Po), jnp.float32),
            jax.ShapeDtypeStruct((Bp, Pl), jnp.float32),
        ),
        grid=(Bp // TB,),
        in_specs=[
            pl.BlockSpec((TB, Pi), lambda b: (b, 0)),    # x (batch-tiled)
            pl.BlockSpec((TB, 1), lambda b: (b, 0)),     # labels (batch-tiled)
        ] + resident_specs,
        out_specs=(
            pl.BlockSpec((TB, Po), lambda b: (b, 0)),    # x_hat
            pl.BlockSpec((TB, Pl), lambda b: (b, 0)),    # z
        ),
        compiler_params=pltpu.CompilerParams(
            dimension_semantics=("parallel",),
            vmem_limit_bytes=vmem_limit,
        ),
    )(x_pad, i_pad, *param_arrays)

    x_hat = x_hat_pad[:B, :output_dim]
    z = z_pad[:B, :latent_dim]
    return x_hat, mu1, mu2, logvar1, logvar2, z


# ----------------------------- param init -------------------------------------

def init_params(key, input_dim, hidden_dim, latent_dim, output_dim):
    ks = jax.random.split(key, 6)

    def lin(k, fan_in, fan_out):
        bound = 1.0 / jnp.sqrt(fan_in)
        kw, kb = jax.random.split(k)
        w = jax.random.uniform(kw, (fan_in, fan_out), jnp.float32, -bound, bound)
        b = jax.random.uniform(kb, (1, fan_out), jnp.float32, -bound, bound)
        return w, b

    ew1, eb1 = lin(ks[0], input_dim, hidden_dim)
    ew2, eb2 = lin(ks[1], hidden_dim, hidden_dim)
    ew3, eb3 = lin(ks[2], hidden_dim, latent_dim)
    dw1, db1 = lin(ks[3], latent_dim, hidden_dim)
    dw2, db2 = lin(ks[4], hidden_dim, hidden_dim)
    dw3, db3 = lin(ks[5], hidden_dim, output_dim)

    return dict(
        ew1=ew1, eb1=eb1, ew2=ew2, eb2=eb2, ew3=ew3, eb3=eb3,
        dw1=dw1, db1=db1, dw2=dw2, db2=db2, dw3=dw3, db3=db3,
        mu1=jnp.ones((latent_dim,), jnp.float32),
        logvar1=jnp.zeros((latent_dim,), jnp.float32),
        mu2=jnp.ones((latent_dim,), jnp.float32),
        logvar2=jnp.zeros((latent_dim,), jnp.float32),
    )


# ----------------------------- reference (pure JAX, same bf16 quant) ------------

def daud_ref(x, i, params, eps1, eps2):
    bf16, f32 = jnp.bfloat16, jnp.float32

    def mm(a, w):
        return jnp.dot(a.astype(bf16), w.astype(bf16), preferred_element_type=f32)

    def enc(x):
        h = jax.nn.relu(mm(x, params["ew1"]) + params["eb1"])
        h = jax.nn.relu(mm(h, params["ew2"]) + params["eb2"])
        return mm(h, params["ew3"]) + params["eb3"]

    def dec(z):
        h = jax.nn.relu(mm(z, params["dw1"]) + params["db1"])
        h = jax.nn.relu(mm(h, params["dw2"]) + params["db2"])
        return mm(h, params["dw3"]) + params["db3"]

    z = enc(x)
    dom1 = params["mu1"] + jnp.exp(0.5 * params["logvar1"]) * eps1
    dom2 = params["mu2"] + jnp.exp(0.5 * params["logvar2"]) * eps2
    xh11, xh1, xh2 = dec(z), dec(z + dom1), dec(z + dom2)
    lab = i.astype(jnp.int32)[:, None]
    return jnp.where(lab == 1, xh1, jnp.where(lab == 0, xh2, xh11)), z


# ----------------------------- main --------------------------------------------

if __name__ == "__main__":
    B, input_dim, hidden_dim, latent_dim, output_dim = 8, 32, 32, 16, 32

    key = jax.random.PRNGKey(0)
    k_x, k_p, k_e1, k_e2 = jax.random.split(key, 4)

    x = jax.random.normal(k_x, (B, input_dim), jnp.float32)
    i = jnp.array([1, 0, 2, 1, 0, 2, 1, 0], jnp.int32)       # per-row domain label
    params = init_params(k_p, input_dim, hidden_dim, latent_dim, output_dim)
    eps1 = jax.random.normal(k_e1, (latent_dim,), jnp.float32)
    eps2 = jax.random.normal(k_e2, (latent_dim,), jnp.float32)

    padded = prepare_padded_params(params)      # one-time pad + bf16 cast (hoisted)

    out = daud_forward(x, i, padded, eps1, eps2, output_dim=output_dim)
    out = jax.block_until_ready(out)
    x_hat, mu1, mu2, logvar1, logvar2, z = out

    # numerical check against pure-JAX reference using the same bf16 weight quantization
    x_hat_ref, z_ref = daud_ref(x, i, params, eps1, eps2)
    assert x_hat.shape == (B, output_dim) and z.shape == (B, latent_dim)
    assert jnp.allclose(z, z_ref, atol=2e-3, rtol=2e-3)
    assert jnp.allclose(x_hat, x_hat_ref, atol=2e-3, rtol=2e-3)

    print("KERNEL_OK")
</pallas_src>

<mosaic_0001>
module attributes {stable_mosaic.version = 11 : i64} {
  func.func @daud_kernel(%arg0: i32, %arg1: memref<8x128xf32, #tpu.memory_space<vmem>>, %arg2: memref<8x1xi32, #tpu.memory_space<vmem>>, %arg3: memref<128x128xbf16, #tpu.memory_space<vmem>>, %arg4: memref<1x128xf32, #tpu.memory_space<vmem>>, %arg5: memref<128x128xbf16, #tpu.memory_space<vmem>>, %arg6: memref<1x128xf32, #tpu.memory_space<vmem>>, %arg7: memref<128x128xbf16, #tpu.memory_space<vmem>>, %arg8: memref<1x128xf32, #tpu.memory_space<vmem>>, %arg9: memref<128x128xbf16, #tpu.memory_space<vmem>>, %arg10: memref<1x128xf32, #tpu.memory_space<vmem>>, %arg11: memref<128x128xbf16, #tpu.memory_space<vmem>>, %arg12: memref<1x128xf32, #tpu.memory_space<vmem>>, %arg13: memref<128x128xbf16, #tpu.memory_space<vmem>>, %arg14: memref<1x128xf32, #tpu.memory_space<vmem>>, %arg15: memref<2x128xf32, #tpu.memory_space<vmem>>, %arg16: memref<8x128xf32, #tpu.memory_space<vmem>>, %arg17: memref<8x128xf32, #tpu.memory_space<vmem>>) attributes {dimension_semantics = [#tpu.dimension_semantics<parallel>], iteration_bounds = array<i64: 1>, scalar_prefetch = 0 : i64, scratch_operands = 0 : i64, tpu.core_type = #tpu.core_type<tc>, window_params = [{transform_indices = @transform_0, window_bounds = array<i64: 8, 128>}, {transform_indices = @transform_1, window_bounds = array<i64: 8, 1>}, {pipeline_mode = #tpu.pipeline_mode<synchronous>, transform_indices = @transform_2, window_bounds = array<i64: 128, 128>}, {pipeline_mode = #tpu.pipeline_mode<synchronous>, transform_indices = @transform_3, window_bounds = array<i64: 1, 128>}, {pipeline_mode = #tpu.pipeline_mode<synchronous>, transform_indices = @transform_4, window_bounds = array<i64: 128, 128>}, {pipeline_mode = #tpu.pipeline_mode<synchronous>, transform_indices = @transform_5, window_bounds = array<i64: 1, 128>}, {pipeline_mode = #tpu.pipeline_mode<synchronous>, transform_indices = @transform_6, window_bounds = array<i64: 128, 128>}, {pipeline_mode = #tpu.pipeline_mode<synchronous>, transform_indices = @transform_7, window_bounds = array<i64: 1, 128>}, {pipeline_mode = #tpu.pipeline_mode<synchronous>, transform_indices = @transform_8, window_bounds = array<i64: 128, 128>}, {pipeline_mode = #tpu.pipeline_mode<synchronous>, transform_indices = @transform_9, window_bounds = array<i64: 1, 128>}, {pipeline_mode = #tpu.pipeline_mode<synchronous>, transform_indices = @transform_10, window_bounds = array<i64: 128, 128>}, {pipeline_mode = #tpu.pipeline_mode<synchronous>, transform_indices = @transform_11, window_bounds = array<i64: 1, 128>}, {pipeline_mode = #tpu.pipeline_mode<synchronous>, transform_indices = @transform_12, window_bounds = array<i64: 128, 128>}, {pipeline_mode = #tpu.pipeline_mode<synchronous>, transform_indices = @transform_13, window_bounds = array<i64: 1, 128>}, {pipeline_mode = #tpu.pipeline_mode<synchronous>, transform_indices = @transform_14, window_bounds = array<i64: 2, 128>}, {transform_indices = @transform_15, window_bounds = array<i64: 8, 128>}, {transform_indices = @transform_16, window_bounds = array<i64: 8, 128>}]} {
    %c0 = arith.constant 0 : index
    %c0_0 = arith.constant 0 : index
    %0 = vector.load %arg1[%c0, %c0_0] : memref<8x128xf32, #tpu.memory_space<vmem>>, vector<8x128xf32>
    %c0_1 = arith.constant 0 : index
    %c0_2 = arith.constant 0 : index
    %1 = vector.load %arg2[%c0_1, %c0_2] : memref<8x1xi32, #tpu.memory_space<vmem>>, vector<8x1xi32>
    %2 = arith.truncf %0 : vector<8x128xf32> to vector<8x128xbf16>
    %c0_3 = arith.constant 0 : index
    %c0_4 = arith.constant 0 : index
    %3 = vector.load %arg3[%c0_3, %c0_4] : memref<128x128xbf16, #tpu.memory_space<vmem>>, vector<128x128xbf16>
    %cst = arith.constant dense<0.000000e+00> : vector<8x128xf32>
    %4 = tpu.matmul %2, %3, %cst {dimension_numbers = #tpu.dot_dimension_numbers<[1], [0], [0], [1], [0, 0, 1, 1], [], []>} : vector<8x128xbf16>, vector<128x128xbf16>, vector<8x128xf32> -> vector<8x128xf32>
    %c0_5 = arith.constant 0 : index
    %c0_6 = arith.constant 0 : index
    %5 = vector.load %arg4[%c0_5, %c0_6] : memref<1x128xf32, #tpu.memory_space<vmem>>, vector<1x128xf32>
    %6 = vector.broadcast %5 : vector<1x128xf32> to vector<8x128xf32>
    %7 = arith.addf %4, %6 : vector<8x128xf32>
    %cst_7 = arith.constant 0.000000e+00 : f32
    %8 = vector.broadcast %cst_7 : f32 to vector<8x128xf32>
    %9 = arith.maximumf %7, %8 : vector<8x128xf32>
    %10 = arith.truncf %9 : vector<8x128xf32> to vector<8x128xbf16>
    %c0_8 = arith.constant 0 : index
    %c0_9 = arith.constant 0 : index
    %11 = vector.load %arg5[%c0_8, %c0_9] : memref<128x128xbf16, #tpu.memory_space<vmem>>, vector<128x128xbf16>
    %cst_10 = arith.constant dense<0.000000e+00> : vector<8x128xf32>
    %12 = tpu.matmul %10, %11, %cst_10 {dimension_numbers = #tpu.dot_dimension_numbers<[1], [0], [0], [1], [0, 0, 1, 1], [], []>} : vector<8x128xbf16>, vector<128x128xbf16>, vector<8x128xf32> -> vector<8x128xf32>
    %c0_11 = arith.constant 0 : index
    %c0_12 = arith.constant 0 : index
    %13 = vector.load %arg6[%c0_11, %c0_12] : memref<1x128xf32, #tpu.memory_space<vmem>>, vector<1x128xf32>
    %14 = vector.broadcast %13 : vector<1x128xf32> to vector<8x128xf32>
    %15 = arith.addf %12, %14 : vector<8x128xf32>
    %cst_13 = arith.constant 0.000000e+00 : f32
    %16 = vector.broadcast %cst_13 : f32 to vector<8x128xf32>
    %17 = arith.maximumf %15, %16 : vector<8x128xf32>
    %18 = arith.truncf %17 : vector<8x128xf32> to vector<8x128xbf16>
    %c0_14 = arith.constant 0 : index
    %c0_15 = arith.constant 0 : index
    %19 = vector.load %arg7[%c0_14, %c0_15] : memref<128x128xbf16, #tpu.memory_space<vmem>>, vector<128x128xbf16>
    %cst_16 = arith.constant dense<0.000000e+00> : vector<8x128xf32>
    %20 = tpu.matmul %18, %19, %cst_16 {dimension_numbers = #tpu.dot_dimension_numbers<[1], [0], [0], [1], [0, 0, 1, 1], [], []>} : vector<8x128xbf16>, vector<128x128xbf16>, vector<8x128xf32> -> vector<8x128xf32>
    %c0_17 = arith.constant 0 : index
    %c0_18 = arith.constant 0 : index
    %21 = vector.load %arg8[%c0_17, %c0_18] : memref<1x128xf32, #tpu.memory_space<vmem>>, vector<1x128xf32>
    %22 = vector.broadcast %21 : vector<1x128xf32> to vector<8x128xf32>
    %23 = arith.addf %20, %22 : vector<8x128xf32>
    %c0_19 = arith.constant 0 : index
    %c0_20 = arith.constant 0 : index
    %24 = vector.load %arg17[%c0_19, %c0_20] : memref<8x128xf32, #tpu.memory_space<vmem>>, vector<8x128xf32>
    tpu.vector_store %arg17[%c0_19, %c0_20], %23 {strides = array<i32>} : memref<8x128xf32, #tpu.memory_space<vmem>>, vector<8x128xf32>,
    %c1_i32 = arith.constant 1 : i32
    %25 = vector.broadcast %c1_i32 : i32 to vector<8x1xi32>
    %26 = arith.cmpi eq, %1, %25 : vector<8x1xi32>
    %c0_21 = arith.constant 0 : index
    %c0_22 = arith.constant 0 : index
    %27 = vector.load %arg15[%c0_21, %c0_22] : memref<2x128xf32, #tpu.memory_space<vmem>>, vector<1x128xf32>
    %c0_i32 = arith.constant 0 : i32
    %28 = vector.broadcast %c0_i32 : i32 to vector<8x1xi32>
    %29 = arith.cmpi eq, %1, %28 : vector<8x1xi32>
    %c1 = arith.constant 1 : index
    %c0_23 = arith.constant 0 : index
    %30 = vector.load %arg15[%c1, %c0_23] : memref<2x128xf32, #tpu.memory_space<vmem>>, vector<1x128xf32>
    %cst_24 = arith.constant 0.000000e+00 : f32
    %31 = vector.shape_cast %29 : vector<8x1xi1> to vector<8x1xi1>
    %32 = vector.broadcast %31 : vector<8x1xi1> to vector<8x128xi1>
    %33 = vector.shape_cast %30 : vector<1x128xf32> to vector<1x128xf32>
    %34 = vector.broadcast %33 : vector<1x128xf32> to vector<8x128xf32>
    %35 = vector.broadcast %cst_24 : f32 to vector<8x128xf32>
    %36 = arith.select %32, %34, %35 : vector<8x128xi1>, vector<8x128xf32>
    %37 = vector.shape_cast %26 : vector<8x1xi1> to vector<8x1xi1>
    %38 = vector.broadcast %37 : vector<8x1xi1> to vector<8x128xi1>
    %39 = vector.shape_cast %27 : vector<1x128xf32> to vector<1x128xf32>
    %40 = vector.broadcast %39 : vector<1x128xf32> to vector<8x128xf32>
    %41 = arith.select %38, %40, %36 : vector<8x128xi1>, vector<8x128xf32>
    %42 = arith.addf %23, %41 : vector<8x128xf32>
    %43 = arith.truncf %42 : vector<8x128xf32> to vector<8x128xbf16>
    %c0_25 = arith.constant 0 : index
    %c0_26 = arith.constant 0 : index
    %44 = vector.load %arg9[%c0_25, %c0_26] : memref<128x128xbf16, #tpu.memory_space<vmem>>, vector<128x128xbf16>
    %cst_27 = arith.constant dense<0.000000e+00> : vector<8x128xf32>
    %45 = tpu.matmul %43, %44, %cst_27 {dimension_numbers = #tpu.dot_dimension_numbers<[1], [0], [0], [1], [0, 0, 1, 1], [], []>} : vector<8x128xbf16>, vector<128x128xbf16>, vector<8x128xf32> -> vector<8x128xf32>
    %c0_28 = arith.constant 0 : index
    %c0_29 = arith.constant 0 : index
    %46 = vector.load %arg10[%c0_28, %c0_29] : memref<1x128xf32, #tpu.memory_space<vmem>>, vector<1x128xf32>
    %47 = vector.broadcast %46 : vector<1x128xf32> to vector<8x128xf32>
    %48 = arith.addf %45, %47 : vector<8x128xf32>
    %cst_30 = arith.constant 0.000000e+00 : f32
    %49 = vector.broadcast %cst_30 : f32 to vector<8x128xf32>
    %50 = arith.maximumf %48, %49 : vector<8x128xf32>
    %51 = arith.truncf %50 : vector<8x128xf32> to vector<8x128xbf16>
    %c0_31 = arith.constant 0 : index
    %c0_32 = arith.constant 0 : index
    %52 = vector.load %arg11[%c0_31, %c0_32] : memref<128x128xbf16, #tpu.memory_space<vmem>>, vector<128x128xbf16>
    %cst_33 = arith.constant dense<0.000000e+00> : vector<8x128xf32>
    %53 = tpu.matmul %51, %52, %cst_33 {dimension_numbers = #tpu.dot_dimension_numbers<[1], [0], [0], [1], [0, 0, 1, 1], [], []>} : vector<8x128xbf16>, vector<128x128xbf16>, vector<8x128xf32> -> vector<8x128xf32>
    %c0_34 = arith.constant 0 : index
    %c0_35 = arith.constant 0 : index
    %54 = vector.load %arg12[%c0_34, %c0_35] : memref<1x128xf32, #tpu.memory_space<vmem>>, vector<1x128xf32>
    %55 = vector.broadcast %54 : vector<1x128xf32> to vector<8x128xf32>
    %56 = arith.addf %53, %55 : vector<8x128xf32>
    %cst_36 = arith.constant 0.000000e+00 : f32
    %57 = vector.broadcast %cst_36 : f32 to vector<8x128xf32>
    %58 = arith.maximumf %56, %57 : vector<8x128xf32>
    %59 = arith.truncf %58 : vector<8x128xf32> to vector<8x128xbf16>
    %c0_37 = arith.constant 0 : index
    %c0_38 = arith.constant 0 : index
    %60 = vector.load %arg13[%c0_37, %c0_38] : memref<128x128xbf16, #tpu.memory_space<vmem>>, vector<128x128xbf16>
    %cst_39 = arith.constant dense<0.000000e+00> : vector<8x128xf32>
    %61 = tpu.matmul %59, %60, %cst_39 {dimension_numbers = #tpu.dot_dimension_numbers<[1], [0], [0], [1], [0, 0, 1, 1], [], []>} : vector<8x128xbf16>, vector<128x128xbf16>, vector<8x128xf32> -> vector<8x128xf32>
    %c0_40 = arith.constant 0 : index
    %c0_41 = arith.constant 0 : index
    %62 = vector.load %arg14[%c0_40, %c0_41] : memref<1x128xf32, #tpu.memory_space<vmem>>, vector<1x128xf32>
    %63 = vector.broadcast %62 : vector<1x128xf32> to vector<8x128xf32>
    %64 = arith.addf %61, %63 : vector<8x128xf32>
    %c0_42 = arith.constant 0 : index
    %c0_43 = arith.constant 0 : index
    %65 = vector.load %arg16[%c0_42, %c0_43] : memref<8x128xf32, #tpu.memory_space<vmem>>, vector<8x128xf32>
    tpu.vector_store %arg16[%c0_42, %c0_43], %64 {strides = array<i32>} : memref<8x128xf32, #tpu.memory_space<vmem>>, vector<8x128xf32>,
    return
  }
  func.func @transform_0(%arg0: i32) -> (i32, i32) {
    %c0_i32 = arith.constant 0 : i32
    %c0_i32_0 = arith.constant 0 : i32
    return %arg0, %c0_i32 : i32, i32
  }
  func.func @transform_1(%arg0: i32) -> (i32, i32) {
    %c0_i32 = arith.constant 0 : i32
    %c0_i32_0 = arith.constant 0 : i32
    return %arg0, %c0_i32 : i32, i32
  }
  func.func @transform_2(%arg0: i32) -> (i32, i32) {
    %c0_i32 = arith.constant 0 : i32
    %c0_i32_0 = arith.constant 0 : i32
    %c0_i32_1 = arith.constant 0 : i32
    return %c0_i32, %c0_i32_0 : i32, i32
  }
  func.func @transform_3(%arg0: i32) -> (i32, i32) {
    %c0_i32 = arith.constant 0 : i32
    %c0_i32_0 = arith.constant 0 : i32
    %c0_i32_1 = arith.constant 0 : i32
    return %c0_i32, %c0_i32_0 : i32, i32
  }
  func.func @transform_4(%arg0: i32) -> (i32, i32) {
    %c0_i32 = arith.constant 0 : i32
    %c0_i32_0 = arith.constant 0 : i32
    %c0_i32_1 = arith.constant 0 : i32
    return %c0_i32, %c0_i32_0 : i32, i32
  }
  func.func @transform_5(%arg0: i32) -> (i32, i32) {
    %c0_i32 = arith.constant 0 : i32
    %c0_i32_0 = arith.constant 0 : i32
    %c0_i32_1 = arith.constant 0 : i32
    return %c0_i32, %c0_i32_0 : i32, i32
  }
  func.func @transform_6(%arg0: i32) -> (i32, i32) {
    %c0_i32 = arith.constant 0 : i32
    %c0_i32_0 = arith.constant 0 : i32
    %c0_i32_1 = arith.constant 0 : i32
    return %c0_i32, %c0_i32_0 : i32, i32
  }
  func.func @transform_7(%arg0: i32) -> (i32, i32) {
    %c0_i32 = arith.constant 0 : i32
    %c0_i32_0 = arith.constant 0 : i32
    %c0_i32_1 = arith.constant 0 : i32
    return %c0_i32, %c0_i32_0 : i32, i32
  }
  func.func @transform_8(%arg0: i32) -> (i32, i32) {
    %c0_i32 = arith.constant 0 : i32
    %c0_i32_0 = arith.constant 0 : i32
    %c0_i32_1 = arith.constant 0 : i32
    return %c0_i32, %c0_i32_0 : i32, i32
  }
  func.func @transform_9(%arg0: i32) -> (i32, i32) {
    %c0_i32 = arith.constant 0 : i32
    %c0_i32_0 = arith.constant 0 : i32
    %c0_i32_1 = arith.constant 0 : i32
    return %c0_i32, %c0_i32_0 : i32, i32
  }
  func.func @transform_10(%arg0: i32) -> (i32, i32) {
    %c0_i32 = arith.constant 0 : i32
    %c0_i32_0 = arith.constant 0 : i32
    %c0_i32_1 = arith.constant 0 : i32
    return %c0_i32, %c0_i32_0 : i32, i32
  }
  func.func @transform_11(%arg0: i32) -> (i32, i32) {
    %c0_i32 = arith.constant 0 : i32
    %c0_i32_0 = arith.constant 0 : i32
    %c0_i32_1 = arith.constant 0 : i32
    return %c0_i32, %c0_i32_0 : i32, i32
  }
  func.func @transform_12(%arg0: i32) -> (i32, i32) {
    %c0_i32 = arith.constant 0 : i32
    %c0_i32_0 = arith.constant 0 : i32
    %c0_i32_1 = arith.constant 0 : i32
    return %c0_i32, %c0_i32_0 : i32, i32
  }
  func.func @transform_13(%arg0: i32) -> (i32, i32) {
    %c0_i32 = arith.constant 0 : i32
    %c0_i32_0 = arith.constant 0 : i32
    %c0_i32_1 = arith.constant 0 : i32
    return %c0_i32, %c0_i32_0 : i32, i32
  }
  func.func @transform_14(%arg0: i32) -> (i32, i32) {
    %c0_i32 = arith.constant 0 : i32
    %c0_i32_0 = arith.constant 0 : i32
    %c0_i32_1 = arith.constant 0 : i32
    return %c0_i32, %c0_i32_0 : i32, i32
  }
  func.func @transform_15(%arg0: i32) -> (i32, i32) {
    %c0_i32 = arith.constant 0 : i32
    %c0_i32_0 = arith.constant 0 : i32
    return %arg0, %c0_i32 : i32, i32
  }
  func.func @transform_16(%arg0: i32) -> (i32, i32) {
    %c0_i32 = arith.constant 0 : i32
    %c0_i32_0 = arith.constant 0 : i32
    return %arg0, %c0_i32 : i32, i32
  }
}

</mosaic_0001>

<bundles_post_ra>
// kernel: daud_forward.1
= control target key start
LH: loop header
LB: loop body
LE: loop exit
PB: predicated region body
PF: predicated region fallthrough
CT: control target
= control target key end

     0   :  { %s1638_s0 = inlined_call_operand.vmem [shape: f32[8,128], index: 0, kind: input, shape index: {}]   ;;  %s1639_s1 = inlined_call_operand.vmem [shape: s32[8,1], index: 1, kind: input, shape index: {}]   ;;  %s1640_s2 = inlined_call_operand.hbm [shape: bf16[128,128], index: 2, kind: input, shape index: {}]   ;;  %s1641_s3 = inlined_call_operand.vmem [shape: f32[1,128], index: 3, kind: input, shape index: {}]   ;;  %s1642_s4 = inlined_call_operand.hbm [shape: bf16[128,128], index: 4, kind: input, shape index: {}]   ;;  %s1643_s5 = inlined_call_operand.vmem [shape: f32[1,128], index: 5, kind: input, shape index: {}]   ;;  %s1644_s6 = inlined_call_operand.hbm [shape: bf16[128,128], index: 6, kind: input, shape index: {}]   ;;  %s1645_s7 = inlined_call_operand.vmem [shape: f32[1,128], index: 7, kind: input, shape index: {}]   ;;  %s1646_s8 = inlined_call_operand.vmem [shape: bf16[128,128], index: 8, kind: input, shape index: {}]   ;;  %s1647_s9 = inlined_call_operand.vmem [shape: f32[1,128], index: 9, kind: input, shape index: {}]   ;;  %s1648_s10 = inlined_call_operand.hbm [shape: bf16[128,128], index: 10, kind: input, shape index: {}]   ;;  %s1649_s11 = inlined_call_operand.vmem [shape: f32[1,128], index: 11, kind: input, shape index: {}]   ;;  %s1650_s12 = inlined_call_operand.hbm [shape: bf16[128,128], index: 12, kind: input, shape index: {}]   ;;  %s1651_s13 = inlined_call_operand.vmem [shape: f32[1,128], index: 13, kind: input, shape index: {}]   ;;  %s1652_s14 = inlined_call_operand.vmem [shape: f32[2,128], index: 14, kind: input, shape index: {}]   ;;  %s1653_s15 = inlined_call_operand.hbm [shape: f32[8,128], index: 15, kind: output, shape index: {0}]   ;;  %s1654_s16 = inlined_call_operand.hbm [shape: f32[8,128], index: 16, kind: output, shape index: {1}]  }
   0x1   :  { %1655 = sst [smem:[#allocation19_spill]] %s1638_s0 }
   0x2   :  { %22 = vsyncpa [#allocation3], 0 }
   0x3   :  { %23 = vsyncpa [#allocation6], 0 }
   0x4   :  { %24 = vsyncpa [#allocation9], 0 }
   0x5   :  { %25 = vsyncpa [#allocation4], 0 }
   0x6   :  { %26 = vsyncpa [#allocation13], 0  ;;  %s1314_s21 = smov [#allocation5]   ;;  %s1315_s23 = smov [#allocation8]  }
   0x7   :  { %s50_s22 = sshll.u32 %s1314_s21, 4  ;;  %s82_s24 = sshll.u32 %s1315_s23, 4  ;;  %s51_s22 = int_to_ptr.vmem [resolvable:$true] %s50_s22  ;;  %s1411_s24 = int_to_ptr.vmem [resolvable:$true] %s82_s24 }
   0x8   :  { %s1150_s27 = scalar_lea.hbm %s1642_s4, 1024 }
   0x9   :  { %p1151_p0 = scmp.ne.s32.totalorder %s1642_s4, %s1150_s27  ;;  %p1154_p1 = scmp.lt.u32.totalorder %s1150_s27, %s1642_s4 }
   0xb   :  { %p1156_p2 = pnand %p1154_p1, %p1151_p0 }
   0xd   :  { %1159 = shalt.err (!%p1156_p2)
}
   0xe   :  { %s1160_s17 = scalar_lea.vmem %s51_s22, 1024  ;;  %p1165_p4 = scmp.lt.s32.totalorder %s51_s22, %s51_s22 }
   0xf   :  { %p1161_p3 = scmp.ne.s32.totalorder %s51_s22, %s1160_s17  ;;  %p1166_p5 = scmp.lt.s32.totalorder %s1160_s17, %s1160_s17 }
  0x11   :  { %p1167_p6 = por %p1166_p5, %p1165_p4 }
  0x13   :  { %p1168_p7 = pnand %p1167_p6, %p1161_p3 }
  0x15   :  { %1171 = shalt.err (!%p1168_p7)
}
  0x16   :  { %s1316_s18 = smov 64   ;;  %s1317_s19 = smov 4  }
  0x17   :  { %56 = dma.hbm_to_vmem [thread:$0]  %s1642_s4, 1024, %s51_s22, [#allocation6], %s1316_s18, %s1316_s18, %s1317_s19  }
  0x18   :  { %s1172_s26 = scalar_lea.hbm %s1648_s10, 1024 }
  0x19   :  { %p1173_p8 = scmp.ne.s32.totalorder %s1648_s10, %s1172_s26  ;;  %p1176_p9 = scmp.lt.u32.totalorder %s1172_s26, %s1648_s10 }
  0x1b   :  { %p1178_p10 = pnand %p1176_p9, %p1173_p8 }
  0x1d   :  { %1181 = shalt.err (!%p1178_p10)
}
  0x1e   :  { %s1182_s0 = scalar_lea.vmem %s1411_s24, 1024  ;;  %p1187_p12 = scmp.lt.s32.totalorder %s1411_s24, %s1411_s24 }
  0x1f   :  { %p1183_p11 = scmp.ne.s32.totalorder %s1411_s24, %s1182_s0  ;;  %p1188_p13 = scmp.lt.s32.totalorder %s1182_s0, %s1182_s0 }
  0x21   :  { %p1189_p0 = por %p1188_p13, %p1187_p12 }
  0x23   :  { %p1190_p1 = pnand %p1189_p0, %p1183_p11 }
  0x25   :  { %1193 = shalt.err (!%p1190_p1)
}
  0x26   :  { %88 = dma.hbm_to_vmem [thread:$0]  %s1648_s10, 1024, %s1411_s24, [#allocation9], %s1316_s18, %s1316_s18, %s1317_s19  }
  0x27   :  { %s1318_s17 = smov [#allocation2]   ;;  %s1319_s21 = smov [#allocation7]  }
  0x28   :  { %s36_s20 = sshll.u32 %s1318_s17, 4  ;;  %s64_s23 = sshll.u32 %s1319_s21, 4  ;;  %s37_s20 = int_to_ptr.vmem [resolvable:$true] %s36_s20  ;;  %s1448_s23 = int_to_ptr.vmem [resolvable:$true] %s64_s23 }
  0x29   :  { %s1194_s27 = scalar_lea.hbm %s1640_s2, 1024 }
  0x2a   :  { %p1195_p2 = scmp.ne.s32.totalorder %s1640_s2, %s1194_s27  ;;  %p1198_p3 = scmp.lt.u32.totalorder %s1194_s27, %s1640_s2 }
  0x2c   :  { %p1200_p4 = pnand %p1198_p3, %p1195_p2 }
  0x2e   :  { %1203 = shalt.err (!%p1200_p4)
}
  0x2f   :  { %s1204_s10 = scalar_lea.vmem %s37_s20, 1024  ;;  %p1209_p6 = scmp.lt.s32.totalorder %s37_s20, %s37_s20 }
  0x30   :  { %p1205_p5 = scmp.ne.s32.totalorder %s37_s20, %s1204_s10  ;;  %p1210_p7 = scmp.lt.s32.totalorder %s1204_s10, %s1204_s10 }
  0x32   :  { %p1211_p8 = por %p1210_p7, %p1209_p6 }
  0x34   :  { %p1212_p9 = pnand %p1211_p8, %p1205_p5 }
  0x36   :  { %1215 = shalt.err (!%p1212_p9)
}
  0x37   :  { %42 = dma.hbm_to_vmem [thread:$0]  %s1640_s2, 1024, %s37_s20, [#allocation3], %s1316_s18, %s1316_s18, %s1317_s19  }
  0x38   :  { %s1216_s21 = scalar_lea.hbm %s1644_s6, 1024 }
  0x39   :  { %p1217_p10 = scmp.ne.s32.totalorder %s1644_s6, %s1216_s21  ;;  %p1220_p11 = scmp.lt.u32.totalorder %s1216_s21, %s1644_s6 }
  0x3b   :  { %p1222_p12 = pnand %p1220_p11, %p1217_p10 }
  0x3d   :  { %1225 = shalt.err (!%p1222_p12)
}
  0x3e   :  { %s1226_s29 = scalar_lea.vmem %s1448_s23, 1024  ;;  %p1231_p0 = scmp.lt.s32.totalorder %s1448_s23, %s1448_s23 }
  0x3f   :  { %p1227_p13 = scmp.ne.s32.totalorder %s1448_s23, %s1226_s29  ;;  %p1232_p1 = scmp.lt.s32.totalorder %s1226_s29, %s1226_s29 }
  0x41   :  { %p1233_p2 = por %p1232_p1, %p1231_p0 }
  0x43   :  { %p1234_p3 = pnand %p1233_p2, %p1227_p13 }
  0x45   :  { %1237 = shalt.err (!%p1234_p3)
}
  0x46   :  { %70 = dma.hbm_to_vmem [thread:$0]  %s1644_s6, 1024, %s1448_s23, [#allocation6], %s1316_s18, %s1316_s18, %s1317_s19  }
  0x47   :  { %s1320_s30 = smov [#allocation10]   ;;  %s1238_s4 = scalar_lea.hbm %s1650_s12, 1024 }
  0x48   :  { %s96_s0 = sshll.u32 %s1320_s30, 4  ;;  %p1239_p4 = scmp.ne.s32.totalorder %s1650_s12, %s1238_s4  ;;  %s97_s0 = int_to_ptr.vmem [resolvable:$true] %s96_s0 }
  0x49   :  { %p1242_p5 = scmp.lt.u32.totalorder %s1238_s4, %s1650_s12 }
  0x4b   :  { %p1244_p6 = pnand %p1242_p5, %p1239_p4 }
  0x4d   :  { %1247 = shalt.err (!%p1244_p6)
}
  0x4e   :  { %s1248_s26 = scalar_lea.vmem %s97_s0, 1024  ;;  %p1253_p8 = scmp.lt.s32.totalorder %s97_s0, %s97_s0 }
  0x4f   :  { %p1249_p7 = scmp.ne.s32.totalorder %s97_s0, %s1248_s26  ;;  %p1254_p9 = scmp.lt.s32.totalorder %s1248_s26, %s1248_s26 }
  0x51   :  { %p1255_p10 = por %p1254_p9, %p1253_p8 }
  0x53   :  { %p1256_p11 = pnand %p1255_p10, %p1249_p7 }
  0x55   :  { %1259 = shalt.err (!%p1256_p11)
}
  0x56   :  { %102 = dma.hbm_to_vmem [thread:$0]  %s1650_s12, 1024, %s97_s0, [#allocation9], %s1316_s18, %s1316_s18, %s1317_s19  }
  0x57   :  { %1304 = dma.done.wait [#allocation3], 1024  }
  0x58   :  { %1305 = vsyncadd [#allocation3], 4294966272 }
  0x59   :  { %1306 = dma.done.wait [#allocation6], 2048  }
  0x5a   :  { %1307 = vsyncadd [#allocation6], 4294965248 }
  0x5b   :  { %1308 = dma.done.wait [#allocation9], 2048  }
  0x5c   :  { %1309 = vsyncadd [#allocation9], 4294965248  ;;  %v1321_v0 = vmov 0.0   ;;  %vm1322_vm0 = vmmov 0   ;;  %v1102_v1 = vld [vmem:[#allocation2] sm:$0xff]   ;;  %v1103_v2 = vld [vmem:[#allocation2 + $0x8] sm:$0xff]  }
  0x5d   :  { %969 = vmatprep.subr.bf16.mxu0 %v1321_v0  ;;  %985 = vmatprep.mubr.msk.bf16.mxu0 %vm1322_vm0, %v1321_v0  ;;  %v1104_v3 = vld [vmem:[#allocation2 + $0x10] sm:$0xff]   ;;  %v1110_v4 = vld [vmem:[#allocation5] sm:$0xff]   ;;  %v1105_v5 = vld [vmem:[#allocation2 + $0x18] sm:$0xff]   ;;  %s1656_s19 = sld [smem:[#allocation19_spill]]  ;;  %v1323_v37 = vmov 0  }
  0x5e   :  { %989 = vmatprep.subr.bf16.mxu1 %v1321_v0  ;;  %1005 = vmatprep.mubr.msk.bf16.mxu1 %vm1322_vm0, %v1321_v0  ;;  %v1111_v6 = vld [vmem:[#allocation5 + $0x8] sm:$0xff]   ;;  %v1106_v7 = vld [vmem:[#allocation2 + $0x20] sm:$0xff]   ;;  %v1112_v8 = vld [vmem:[#allocation5 + $0x10] sm:$0xff]  }
  0x5f   :  { %970 = vmatpush3.bf16.msra.mxu0 %v1102_v1  ;;  %990 = vmatpush3.bf16.msra.mxu1 %v1110_v4  ;;  %v1107_v9 = vld [vmem:[#allocation2 + $0x28] sm:$0xff]   ;;  %v1113_v10 = vld [vmem:[#allocation5 + $0x18] sm:$0xff]   ;;  %v1108_v11 = vld [vmem:[#allocation2 + $0x30] sm:$0xff]  }
  0x60   :  { %971 = vmatprep.subr.bf16.mxu0 %v1321_v0  ;;  %991 = vmatprep.subr.bf16.mxu1 %v1321_v0  ;;  %v1114_v12 = vld [vmem:[#allocation5 + $0x20] sm:$0xff]   ;;  %v1109_v13 = vld [vmem:[#allocation2 + $0x38] sm:$0xff]   ;;  %v1115_v15 = vld [vmem:[#allocation5 + $0x28] sm:$0xff]  }
  0x61   :  { %v1116_v17 = vld [vmem:[#allocation5 + $0x30] sm:$0xff]   ;;  %v1117_v18 = vld [vmem:[#allocation5 + $0x38] sm:$0xff]   ;;  %v1118_v19 = vld [vmem:[#allocation7] sm:$0xff]   ;;  %1101 = vset.pattern.permute.xlu0 %v1323_v37 }
  0x62   :  { %v1119_v20 = vld [vmem:[#allocation7 + $0x8] sm:$0xff]   ;;  %v1120_v21 = vld [vmem:[#allocation7 + $0x10] sm:$0xff]   ;;  %v1121_v22 = vld [vmem:[#allocation7 + $0x18] sm:$0xff]  }
  0x63   :  { %972 = vmatpush3.bf16.msra.mxu0 %v1103_v2  ;;  %992 = vmatpush3.bf16.msra.mxu1 %v1111_v6  ;;  %v123_v14 = vld [vmem:[%s1656_s19] sm:$0xff]  ;;  %v1123_v24 = vld [vmem:[#allocation7 + $0x28] sm:$0xff]   ;;  %v1124_v33 = vld [vmem:[#allocation7 + $0x30] sm:$0xff]  }
  0x64   :  { %973 = vmatprep.subr.bf16.mxu0 %v1321_v0  ;;  %993 = vmatprep.subr.bf16.mxu1 %v1321_v0  ;;  %v125_v16 = vpack.c.bf16 %v123_v14, %v123_v14  ;;  %v1122_v23 = vld [vmem:[#allocation7 + $0x20] sm:$0xff]   ;;  %v1125_v34 = vld [vmem:[#allocation7 + $0x38] sm:$0xff]   ;;  %v1127_v39 = vld [vmem:[%s1646_s8 + $0x8] sm:$0xff]  }
  0x65   :  { %v859_v25 = vld [vmem:[%s1641_s3] ss:$0 sm:$0xff]  ;;  %v1128_v41 = vld [vmem:[%s1646_s8 + $0x10] sm:$0xff]   ;;  %v1129_v42 = vld [vmem:[%s1646_s8 + $0x18] sm:$0xff]  }
  0x66   :  { %v124_v35 = vld [vmem:[%s1639_s1] sm:$0xff]  ;;  %v1131_v44 = vld [vmem:[%s1646_s8 + $0x28] sm:$0xff]   ;;  %v1132_v53 = vld [vmem:[%s1646_s8 + $0x30] sm:$0xff]  }
  0x67   :  { %974 = vmatpush3.bf16.msra.mxu0 %v1104_v3  ;;  %994 = vmatpush3.bf16.msra.mxu1 %v1112_v8  ;;  %v1126_v36 = vld [vmem:[%s1646_s8] sm:$0xff]   ;;  %vm466_vm1 = vcmp.eq.s32.totalorder %v124_v35, 0  ;;  %vm464_vm2 = vcmp.eq.s32.totalorder %v124_v35, 1  ;;  %v1133_v54 = vld [vmem:[%s1646_s8 + $0x38] sm:$0xff]   ;;  %v1135_v56 = vld [vmem:[#allocation8 + $0x8] sm:$0xff]  }
  0x68   :  { %975 = vmatprep.subr.bf16.mxu0 %v1321_v0  ;;  %995 = vmatprep.subr.bf16.mxu1 %v1321_v0  ;;  %v468_v38 = vsel %vm466_vm1, 1, %v1323_v37  ;;  %v478_v40 = vsel %vm464_vm2, 1, %v1323_v37  ;;  %v1130_v43 = vld [vmem:[%s1646_s8 + $0x20] sm:$0xff]   ;;  %v1136_v57 = vld [vmem:[#allocation8 + $0x10] sm:$0xff]   ;;  %v1137_v58 = vld [vmem:[#allocation8 + $0x18] sm:$0xff]  }
  0x69   :  { %470 = vperm.xlu0 %1101, %v468_v38   ;;  %v868_v45 = vld [vmem:[%s1643_s5] ss:$0 sm:$0xff]  ;;  %v1139_v60 = vld [vmem:[#allocation8 + $0x28] sm:$0xff]   ;;  %v886_v62 = vld [vmem:[%s1652_s14 + $0x1] ss:$0 sm:$0xff] }
  0x6a   :  { %v1134_v55 = vld [vmem:[#allocation8] sm:$0xff]  }
  0x6b   :  { %976 = vmatpush3.bf16.msra.mxu0 %v1105_v5  ;;  %996 = vmatpush3.bf16.msra.mxu1 %v1113_v10  ;;  %v1138_v59 = vld [vmem:[#allocation8 + $0x20] sm:$0xff]  }
  0x6c   :  { %977 = vmatprep.subr.bf16.mxu0 %v1321_v0  ;;  %997 = vmatprep.subr.bf16.mxu1 %v1321_v0  ;;  %v877_v1 = vld [vmem:[%s1645_s7] ss:$0 sm:$0xff] }
  0x6d   :  { %480 = vperm.xlu0 %1101, %v478_v40   ;;  %v887_v3 = vld [vmem:[%s1652_s14] ss:$0 sm:$0xff] }
  0x6e   :  { %v1142_v14 = vld [vmem:[#allocation10] sm:$0xff]  }
  0x6f   :  { %978 = vmatpush3.bf16.msra.mxu0 %v1106_v7  ;;  %998 = vmatpush3.bf16.msra.mxu1 %v1114_v12  ;;  %v1140_v12 = vld [vmem:[#allocation8 + $0x30] sm:$0xff]  }
  0x70   :  { %979 = vmatprep.subr.bf16.mxu0 %v1321_v0  ;;  %999 = vmatprep.subr.bf16.mxu1 %v1321_v0 }
  0x73   :  { %980 = vmatpush3.bf16.msra.mxu0 %v1107_v9  ;;  %1000 = vmatpush3.bf16.msra.mxu1 %v1115_v15  ;;  %v1143_v15 = vld [vmem:[#allocation10 + $0x8] sm:$0xff]  }
  0x74   :  { %981 = vmatprep.subr.bf16.mxu0 %v1321_v0  ;;  %1001 = vmatprep.subr.bf16.mxu1 %v1321_v0 }
  0x77   :  { %982 = vmatpush3.bf16.msra.mxu0 %v1108_v11  ;;  %1002 = vmatpush3.bf16.msra.mxu1 %v1116_v17  ;;  %v1145_v17 = vld [vmem:[#allocation10 + $0x18] sm:$0xff]  }
  0x78   :  { %983 = vmatprep.subr.bf16.mxu0 %v1321_v0  ;;  %1003 = vmatprep.subr.bf16.mxu1 %v1321_v0 }
  0x7b   :  { %984 = vmatpush3.bf16.msra.mxu0 %v1109_v13  ;;  %1004 = vmatpush3.bf16.msra.mxu1 %v1117_v18  ;;  %v1141_v13 = vld [vmem:[#allocation8 + $0x38] sm:$0xff]   ;;  %v1146_v18 = vld [vmem:[#allocation10 + $0x20] sm:$0xff]  }
  0x7c   :  { %1009 = vmatprep.subr.bf16.mxu0 %v1321_v0  ;;  %1029 = vmatprep.subr.bf16.mxu1 %v1321_v0 }
  0x7e   :  { %986 = vmatmul.mubr.bf16.vlgmr.msra.gmra.mrb[0].mxu0 %v125_v16  ;;  %v1144_v16 = vld [vmem:[#allocation10 + $0x10] sm:$0xff]  }
  0x7f   :  { %1025 = vmatprep.mubr.msk.bf16.mxu0 %vm1322_vm0, %v1321_v0  ;;  %1010 = vmatpush3.bf16.msra.mxu0 %v1118_v19  ;;  %v1147_v19 = vld [vmem:[#allocation10 + $0x28] sm:$0xff]  }
  0x80   :  { %1011 = vmatprep.subr.bf16.mxu0 %v1321_v0 }
  0x83   :  { %1012 = vmatpush3.bf16.msra.mxu0 %v1119_v20  ;;  %v888_v20 = vld [vmem:[%s1647_s9] ss:$0 sm:$0xff]  ;;  %s1324_s9 = smov [#allocation12]  }
  0x84   :  { %1013 = vmatprep.subr.bf16.mxu0 %v1321_v0  ;;  %s844_s30 = sshll.u32 %s1324_s9, 4  ;;  %s845_s30 = int_to_ptr.vmem [resolvable:$true] %s844_s30 }
  0x85   :  { %s1260_s0 = scalar_lea.vmem %s845_s30, 128  ;;  %p1265_p13 = scmp.lt.s32.totalorder %s845_s30, %s845_s30 }
  0x86   :  { %p1261_p12 = scmp.ne.s32.totalorder %s845_s30, %s1260_s0  ;;  %p1266_p0 = scmp.lt.s32.totalorder %s1260_s0, %s1260_s0 }
  0x87   :  { %1014 = vmatpush3.bf16.msra.mxu0 %v1120_v21 }
  0x88   :  { %1015 = vmatprep.subr.bf16.mxu0 %v1321_v0  ;;  %p1267_p1 = por %p1266_p0, %p1265_p13 }
  0x8a   :  { %p1268_p2 = pnand %p1267_p1, %p1261_p12 }
  0x8b   :  { %1016 = vmatpush3.bf16.msra.mxu0 %v1121_v22 }
  0x8c   :  { %1017 = vmatprep.subr.bf16.mxu0 %v1321_v0 }
  0x8f   :  { %1018 = vmatpush3.bf16.msra.mxu0 %v1122_v23 }
  0x90   :  { %1019 = vmatprep.subr.bf16.mxu0 %v1321_v0 }
  0x93   :  { %1020 = vmatpush3.bf16.msra.mxu0 %v1123_v24 }
  0x94   :  { %1021 = vmatprep.subr.bf16.mxu0 %v1321_v0 }
  0x97   :  { %1022 = vmatpush3.bf16.msra.mxu0 %v1124_v33 }
  0x98   :  { %1023 = vmatprep.subr.bf16.mxu0 %v1321_v0 }
  0x9b   :  { %1024 = vmatpush3.bf16.msra.mxu0 %v1125_v34 }
  0x9c   :  { %1049 = vmatprep.subr.bf16.mxu0 %v1321_v0 }
  0xe8   :  { %v471_v61 = vpop.permute.xlu0 %470 }
  0xe9   :  { %vm472_vm3 = vcmp.eq.s32.totalorder %v471_v61, 1 }
  0xea   :  { %v477_v2 = vsel %vm472_vm3, %v886_v62, 0.0 }
  0xec   :  { %v481_v63 = vpop.permute.xlu0 %480 }
  0xed   :  { %vm482_vm4 = vcmp.eq.s32.totalorder %v481_v63, 1 }
  0xee   :  { %v487_v7 = vsel %vm482_vm4, %v887_v3, %v477_v2 }
 0x151   :  { %v231_v26 = vpop.f32.mrb[0].mxu0 }
 0x152   :  { %v232_v27 = vadd.f32 %v859_v25, %v231_v26  ;;  %v987_v28 = vpop.f32.mrb[1].mxu0 }
 0x153   :  { %v234_v29 = vpop.f32.mrb[2].mxu0  ;;  %v1148_v28 = vld [vmem:[#allocation10 + $0x30] sm:$0xff]  }
 0x154   :  { %v237_v30 = vmax.f32 %v232_v27, 0.0  ;;  %v988_v31 = vpop.f32.mrb[3].mxu0  ;;  %v1149_v29 = vld [vmem:[#allocation10 + $0x38] sm:$0xff]  }
 0x156   :  { %v238_v32 = vpack.c.bf16 %v237_v30, %v237_v30  ;;  %v897_v30 = vld [vmem:[%s1649_s11] ss:$0 sm:$0xff] }
 0x158   :  { %1006 = vmatmul.mubr.bf16.vlgmr.msra.gmra.mrb[0].mxu1 %v238_v32 }
 0x159   :  { %1045 = vmatprep.mubr.msk.bf16.mxu1 %vm1322_vm0, %v1321_v0  ;;  %1030 = vmatpush3.bf16.msra.mxu1 %v1126_v36 }
 0x15a   :  { %1031 = vmatprep.subr.bf16.mxu1 %v1321_v0 }
 0x15d   :  { %1032 = vmatpush3.bf16.msra.mxu1 %v1127_v39 }
 0x15e   :  { %1033 = vmatprep.subr.bf16.mxu1 %v1321_v0 }
 0x161   :  { %1034 = vmatpush3.bf16.msra.mxu1 %v1128_v41 }
 0x162   :  { %1035 = vmatprep.subr.bf16.mxu1 %v1321_v0 }
 0x165   :  { %1036 = vmatpush3.bf16.msra.mxu1 %v1129_v42 }
 0x166   :  { %1037 = vmatprep.subr.bf16.mxu1 %v1321_v0 }
 0x169   :  { %1038 = vmatpush3.bf16.msra.mxu1 %v1130_v43 }
 0x16a   :  { %1039 = vmatprep.subr.bf16.mxu1 %v1321_v0 }
 0x16d   :  { %1040 = vmatpush3.bf16.msra.mxu1 %v1131_v44 }
 0x16e   :  { %1041 = vmatprep.subr.bf16.mxu1 %v1321_v0 }
 0x171   :  { %1042 = vmatpush3.bf16.msra.mxu1 %v1132_v53 }
 0x172   :  { %1043 = vmatprep.subr.bf16.mxu1 %v1321_v0 }
 0x175   :  { %1044 = vmatpush3.bf16.msra.mxu1 %v1133_v54 }
 0x176   :  { %1069 = vmatprep.subr.bf16.mxu1 %v1321_v0 }
 0x22b   :  { %v344_v46 = vpop.f32.mrb[0].mxu1 }
 0x22c   :  { %v345_v47 = vadd.f32 %v868_v45, %v344_v46  ;;  %v1007_v48 = vpop.f32.mrb[1].mxu1 }
 0x22d   :  { %v347_v49 = vpop.f32.mrb[2].mxu1 }
 0x22e   :  { %v350_v50 = vmax.f32 %v345_v47, 0.0  ;;  %v1008_v51 = vpop.f32.mrb[3].mxu1 }
 0x230   :  { %v351_v52 = vpack.c.bf16 %v350_v50, %v350_v50 }
 0x232   :  { %1026 = vmatmul.mubr.bf16.vlgmr.msra.gmra.mrb[4].mxu0 %v351_v52 }
 0x233   :  { %1065 = vmatprep.mubr.msk.bf16.mxu0 %vm1322_vm0, %v1321_v0  ;;  %1050 = vmatpush3.bf16.msra.mxu0 %v1134_v55 }
 0x234   :  { %1051 = vmatprep.subr.bf16.mxu0 %v1321_v0 }
 0x237   :  { %1052 = vmatpush3.bf16.msra.mxu0 %v1135_v56 }
 0x238   :  { %1053 = vmatprep.subr.bf16.mxu0 %v1321_v0 }
 0x23b   :  { %1054 = vmatpush3.bf16.msra.mxu0 %v1136_v57 }
 0x23c   :  { %1055 = vmatprep.subr.bf16.mxu0 %v1321_v0 }
 0x23f   :  { %1056 = vmatpush3.bf16.msra.mxu0 %v1137_v58 }
 0x240   :  { %1057 = vmatprep.subr.bf16.mxu0 %v1321_v0 }
 0x243   :  { %1058 = vmatpush3.bf16.msra.mxu0 %v1138_v59 }
 0x244   :  { %1059 = vmatprep.subr.bf16.mxu0 %v1321_v0 }
 0x247   :  { %1060 = vmatpush3.bf16.msra.mxu0 %v1139_v60 }
 0x248   :  { %1061 = vmatprep.subr.bf16.mxu0 %v1321_v0 }
 0x24b   :  { %1062 = vmatpush3.bf16.msra.mxu0 %v1140_v12 }
 0x24c   :  { %1063 = vmatprep.subr.bf16.mxu0 %v1321_v0 }
 0x24f   :  { %1064 = vmatpush3.bf16.msra.mxu0 %v1141_v13 }
 0x305   :  { %v457_v4 = vpop.f32.mrb[4].mxu0 }
 0x306   :  { %v458_v5 = vadd.f32 %v877_v1, %v457_v4  ;;  %v1027_v6 = vpop.f32.mrb[5].mxu0 }
 0x307   :  { %v460_v8 = vpop.f32.mrb[6].mxu0 }
 0x308   :  { %v488_v9 = vadd.f32 %v487_v7, %v458_v5  ;;  %463 = vst [vmem:[#allocation12] sm:$0xff] %v458_v5  ;;  %v1028_v10 = vpop.f32.mrb[7].mxu0 }
 0x30a   :  { %v489_v11 = vpack.c.bf16 %v488_v9, %v488_v9 }
 0x30c   :  { %1046 = vmatmul.mubr.bf16.vlgmr.msra.gmra.mrb[4].mxu1 %v489_v11 }
 0x30d   :  { %1085 = vmatprep.mubr.msk.bf16.mxu1 %vm1322_vm0, %v1321_v0  ;;  %1070 = vmatpush3.bf16.msra.mxu1 %v1142_v14 }
 0x30e   :  { %1071 = vmatprep.subr.bf16.mxu1 %v1321_v0 }
 0x311   :  { %1072 = vmatpush3.bf16.msra.mxu1 %v1143_v15 }
 0x312   :  { %1073 = vmatprep.subr.bf16.mxu1 %v1321_v0 }
 0x315   :  { %1074 = vmatpush3.bf16.msra.mxu1 %v1144_v16 }
 0x316   :  { %1075 = vmatprep.subr.bf16.mxu1 %v1321_v0 }
 0x319   :  { %1076 = vmatpush3.bf16.msra.mxu1 %v1145_v17 }
 0x31a   :  { %1077 = vmatprep.subr.bf16.mxu1 %v1321_v0 }
 0x31d   :  { %1078 = vmatpush3.bf16.msra.mxu1 %v1146_v18 }
 0x31e   :  { %1079 = vmatprep.subr.bf16.mxu1 %v1321_v0 }
 0x321   :  { %1080 = vmatpush3.bf16.msra.mxu1 %v1147_v19 }
 0x322   :  { %1081 = vmatprep.subr.bf16.mxu1 %v1321_v0 }
 0x325   :  { %1082 = vmatpush3.bf16.msra.mxu1 %v1148_v28 }
 0x326   :  { %1083 = vmatprep.subr.bf16.mxu1 %v1321_v0 }
 0x329   :  { %1084 = vmatpush3.bf16.msra.mxu1 %v1149_v29 }
 0x3df   :  { %v595_v21 = vpop.f32.mrb[4].mxu1 }
 0x3e0   :  { %v596_v22 = vadd.f32 %v888_v20, %v595_v21  ;;  %v1047_v23 = vpop.f32.mrb[5].mxu1 }
 0x3e1   :  { %v598_v24 = vpop.f32.mrb[6].mxu1 }
 0x3e2   :  { %v601_v25 = vmax.f32 %v596_v22, 0.0  ;;  %v1048_v26 = vpop.f32.mrb[7].mxu1 }
 0x3e4   :  { %v602_v27 = vpack.c.bf16 %v601_v25, %v601_v25 }
 0x3e6   :  { %1066 = vmatmul.mubr.bf16.vlgmr.msra.gmra.mrb[8].mxu0 %v602_v27 }
 0x4b9   :  { %v708_v31 = vpop.f32.mrb[8].mxu0 }
 0x4ba   :  { %v709_v32 = vadd.f32 %v897_v30, %v708_v31  ;;  %v1067_v33 = vpop.f32.mrb[9].mxu0 }
 0x4bb   :  { %v711_v34 = vpop.f32.mrb[10].mxu0 }
 0x4bc   :  { %v714_v35 = vmax.f32 %v709_v32, 0.0  ;;  %v1068_v36 = vpop.f32.mrb[11].mxu0 }
 0x4be   :  { %v715_v37 = vpack.c.bf16 %v714_v35, %v714_v35 }
 0x4c0   :  { %1086 = vmatmul.mubr.bf16.vlgmr.msra.gmra.mrb[8].mxu1 %v715_v37 }
 0x4c1   :  { %1271 = shalt.err (!%p1268_p2)
}
 0x4c2   :  { %s1272_s10 = scalar_lea.hbm %s1654_s16, 128 }
 0x4c3   :  { %p1273_p3 = scmp.ne.s32.totalorder %s1654_s16, %s1272_s10  ;;  %p1276_p4 = scmp.lt.u32.totalorder %s1272_s10, %s1654_s16 }
 0x4c5   :  { %p1278_p5 = pnand %p1276_p4, %p1273_p3 }
 0x4c7   :  { %1281 = shalt.err (!%p1278_p5)
}
 0x4c8   :  { %847 = dma.vmem_to_hbm [thread:$0]  %s845_s30, 128, %s1654_s16, [#allocation13]   ;;  %v906_v0 = vld [vmem:[%s1651_s13] ss:$0 sm:$0xff] }
 0x4c9   :  { %s1325_s23 = smov [#allocation11]  }
 0x4ca   :  { %s834_s12 = sshll.u32 %s1325_s23, 4  ;;  %s835_s12 = int_to_ptr.vmem [resolvable:$true] %s834_s12 }
 0x4cb   :  { %s1282_s18 = scalar_lea.vmem %s835_s12, 128  ;;  %p1287_p7 = scmp.lt.s32.totalorder %s835_s12, %s835_s12 }
 0x4cc   :  { %p1283_p6 = scmp.ne.s32.totalorder %s835_s12, %s1282_s18  ;;  %p1288_p8 = scmp.lt.s32.totalorder %s1282_s18, %s1282_s18 }
 0x4ce   :  { %p1289_p9 = por %p1288_p8, %p1287_p7 }
 0x4d0   :  { %p1290_p10 = pnand %p1289_p9, %p1283_p6 }
 0x593   :  { %v821_v38 = vpop.f32.mrb[8].mxu1 }
 0x594   :  { %v822_v39 = vadd.f32 %v906_v0, %v821_v38  ;;  %v1087_v40 = vpop.f32.mrb[9].mxu1 }
 0x595   :  { %v824_v41 = vpop.f32.mrb[10].mxu1 }
 0x596   :  { %827 = vst [vmem:[#allocation11] sm:$0xff] %v822_v39  ;;  %v1088_v42 = vpop.f32.mrb[11].mxu1 }
 0x597   :  { %1293 = shalt.err (!%p1290_p10)
}
 0x598   :  { %s1294_s13 = scalar_lea.hbm %s1653_s15, 128 }
 0x599   :  { %p1295_p11 = scmp.ne.s32.totalorder %s1653_s15, %s1294_s13  ;;  %p1298_p12 = scmp.lt.u32.totalorder %s1294_s13, %s1653_s15 }
 0x59b   :  { %p1300_p13 = pnand %p1298_p12, %p1295_p11 }
 0x59d   :  { %1303 = shalt.err (!%p1300_p13)
}
 0x59e   :  { %837 = dma.vmem_to_hbm [thread:$0]  %s835_s12, 128, %s1653_s15, [#allocation4]  }
 0x59f   :  { %1310 = dma.done.wait [#allocation4], 128  }
 0x5a0   :  { %1311 = vsyncadd [#allocation4], 4294967168 }
 0x5a1   :  { %1312 = dma.done.wait [#allocation13], 128  }
 0x5a2   :  { %1313 = vsyncadd [#allocation13], 4294967168 }
 0x5a3   :  { %854 = vsyncpa [#allocation3], 1 }
 0x5a4   :  { %855 = vsyncpa [#allocation6], 1 }
 0x5a5   :  { %856 = vsyncpa [#allocation9], 1 }
 0x5a6   :  { %857 = vsyncpa [#allocation4], 1 }
 0x5a7   :  { %858 = vsyncpa [#allocation13], 1 }

</bundles_post_ra>
